<compile_context>
chip_gen: v6e
topology: v6e:2x2x1
jax: 0.10.0
libtpu: 0.0.40
codegen_flags: <defaults>
</compile_context>

<pallas_src>
import jax
import jax.numpy as jnp
from jax.experimental import pallas as pl
from jax.experimental.pallas import tpu as pltpu

# Layer dims of the PyTorch module, (out_features, in_features).
_LAYER_DIMS = [(20, 11), (20, 20), (20, 20), (20, 20), (20, 20), (3, 20)]
_IN_DIM = 11
_HID = 20
_OUT_ROWS = 3
_F_IN_PAD = 16     # 11 input features + 1 ones-row, padded to a sublane multiple
_F_PAD = 24        # 20 hidden features + 1 ones-row, padded to a sublane multiple
_ONES_IN = 11      # ones-row index in the padded input
_ONES_HID = 20     # ones-row index in the hidden activations
_MAX_TB = 4096     # lane-tile cap (multiple of 512 keeps all v5e MXUs fed)


def _mlp_kernel(x_ref, w0_ref, w_ref, o_ref):
    # x_ref : (F_IN_PAD, TB)    input, batch on lanes; row _ONES_IN == 1.0
    # w0_ref: (F_PAD, F_IN_PAD) layer-0 weight, bias folded into col _ONES_IN,
    #                           diagonal 1 at [_ONES_HID, _ONES_IN]
    # w_ref : (5, F_PAD, F_PAD) layers 1..5, bias folded into col _ONES_HID,
    #                           diagonal 1 at [_ONES_HID, _ONES_HID] (layers 1..4)
    # o_ref : (OUT_ROWS, TB)
    h = jnp.maximum(
        jnp.dot(w0_ref[...], x_ref[...], preferred_element_type=jnp.float32), 0.0)
    for l in range(4):
        h = jnp.maximum(
            jnp.dot(w_ref[l], h, preferred_element_type=jnp.float32), 0.0)
    h = jnp.dot(w_ref[4], h, preferred_element_type=jnp.float32)
    o_ref[...] = h[:_OUT_ROWS, :].astype(o_ref.dtype)


def _round_up(x, m):
    return ((x + m - 1) // m) * m


def _pick_tile(batch):
    """Lane-tile size: big tiles to amortize per-step overhead, >=2 tiles for
    large batches so v7x megacore can shard the 'parallel' batch axis."""
    if batch <= 2048:
        return _round_up(max(batch, 1), 128)        # single tile, minimal padding
    if batch <= 2 * _MAX_TB:
        return _round_up((batch + 1) // 2, 512)     # two tiles
    return _MAX_TB


def _pack_params(params):
    """Zero-pad and bias-fold the 6 layers into two weight slabs."""
    # Layer 0: (F_PAD, F_IN_PAD)
    w0, b0 = params[0]
    w0_aug = jnp.zeros((_F_PAD, _F_IN_PAD), jnp.float32)
    w0_aug = w0_aug.at[:_HID, :_IN_DIM].set(w0.astype(jnp.float32))
    w0_aug = w0_aug.at[:_HID, _ONES_IN].set(b0.astype(jnp.float32))
    w0_aug = w0_aug.at[_ONES_HID, _ONES_IN].set(1.0)   # propagate the ones-row

    # Layers 1..5: (F_PAD, F_PAD) each.
    ws = []
    for l in range(1, len(params)):
        w, b = params[l]
        out_d = w.shape[0]
        wa = jnp.zeros((_F_PAD, _F_PAD), jnp.float32)
        wa = wa.at[:out_d, :_HID].set(w.astype(jnp.float32))
        wa = wa.at[:out_d, _ONES_HID].set(b.astype(jnp.float32))
        if l < len(params) - 1:
            wa = wa.at[_ONES_HID, _ONES_HID].set(1.0)  # keep ones-row alive
        ws.append(wa)
    w_slab = jnp.stack(ws, axis=0)                     # (5, F_PAD, F_PAD)
    return w0_aug, w_slab


@jax.jit
def net_forward(x, params):
    """x: (B, 11) float32; params: list of (W, b), W in PyTorch (out, in) layout."""
    B, in_dim = x.shape
    assert in_dim == _IN_DIM

    tb = _pick_tile(B)
    b_pad = _round_up(B, tb)

    w0_aug, w_slab = _pack_params(params)

    # Batch-on-lanes input: (F_IN_PAD, b_pad); row _ONES_IN carries the bias lane.
    x_t = jnp.zeros((_F_IN_PAD, b_pad), jnp.float32)
    x_t = x_t.at[:_IN_DIM, :B].set(x.astype(jnp.float32).T)
    x_t = x_t.at[_ONES_IN, :].set(1.0)

    out = pl.pallas_call(
        _mlp_kernel,
        out_shape=jax.ShapeDtypeStruct((_OUT_ROWS, b_pad), jnp.float32),
        grid=(b_pad // tb,),
        in_specs=[
            pl.BlockSpec((_F_IN_PAD, tb), lambda i: (0, i)),
            pl.BlockSpec((_F_PAD, _F_IN_PAD), lambda i: (0, 0)),
            pl.BlockSpec((w_slab.shape[0], _F_PAD, _F_PAD), lambda i: (0, 0, 0)),
        ],
        out_specs=pl.BlockSpec((_OUT_ROWS, tb), lambda i: (0, i)),
        compiler_params=pltpu.CompilerParams(
            dimension_semantics=("parallel",)),
    )(x_t, w0_aug, w_slab)

    # Padded batch lanes carry bias garbage; sliced off here.
    return out[:, :B].T


def init_params(key):
    """Deterministic init mimicking PyTorch Linear default (uniform +/-1/sqrt(fan_in))."""
    params = []
    for (fan_out, fan_in) in _LAYER_DIMS:
        key, kw, kb = jax.random.split(key, 3)
        bound = 1.0 / jnp.sqrt(jnp.float32(fan_in))
        w = jax.random.uniform(kw, (fan_out, fan_in), jnp.float32, -bound, bound)
        b = jax.random.uniform(kb, (fan_out,), jnp.float32, -bound, bound)
        params.append((w, b))
    return params


if __name__ == "__main__":
    key = jax.random.PRNGKey(0)
    key, kx = jax.random.split(key)
    params = init_params(key)

    def ref_forward(xx):
        h = xx
        for i, (w, b) in enumerate(params):
            h = h @ w.T + b
            if i < len(params) - 1:
                h = jnp.maximum(h, 0.0)
        return h

    # Small batch (single tile).
    B = 4
    x = jax.random.normal(kx, (B, _IN_DIM), dtype=jnp.float32)
    y = net_forward(x, params)
    jax.block_until_ready(y)
    assert y.shape == (B, 3)
    assert jnp.allclose(y, ref_forward(x), atol=1e-5, rtol=1e-5)

    # Larger batch exercising batch padding + a multi-step "parallel" grid (2 tiles).
    B2 = 3000
    x2 = jax.random.normal(jax.random.PRNGKey(1), (B2, _IN_DIM), dtype=jnp.float32)
    y2 = net_forward(x2, params)
    jax.block_until_ready(y2)
    assert y2.shape == (B2, 3)
    assert jnp.allclose(y2, ref_forward(x2), atol=1e-4, rtol=1e-4)

    print("KERNEL_OK")
</pallas_src>

<mosaic_0001>
module attributes {stable_mosaic.version = 11 : i64} {
  func.func @_mlp_kernel(%arg0: i32, %arg1: memref<16x128xf32, #tpu.memory_space<vmem>>, %arg2: memref<24x16xf32, #tpu.memory_space<vmem>>, %arg3: memref<5x24x24xf32, #tpu.memory_space<vmem>>, %arg4: memref<3x128xf32, #tpu.memory_space<vmem>>) attributes {dimension_semantics = [#tpu.dimension_semantics<parallel>], iteration_bounds = array<i64: 1>, scalar_prefetch = 0 : i64, scratch_operands = 0 : i64, tpu.core_type = #tpu.core_type<tc>, window_params = [{transform_indices = @transform_0, window_bounds = array<i64: 16, 128>}, {pipeline_mode = #tpu.pipeline_mode<synchronous>, transform_indices = @transform_1, window_bounds = array<i64: 24, 16>}, {pipeline_mode = #tpu.pipeline_mode<synchronous>, transform_indices = @transform_2, window_bounds = array<i64: 5, 24, 24>}, {transform_indices = @transform_3, window_bounds = array<i64: 3, 128>}]} {
    %c0 = arith.constant 0 : index
    %c0_0 = arith.constant 0 : index
    %0 = vector.load %arg2[%c0, %c0_0] : memref<24x16xf32, #tpu.memory_space<vmem>>, vector<24x16xf32>
    %c0_1 = arith.constant 0 : index
    %c0_2 = arith.constant 0 : index
    %1 = vector.load %arg1[%c0_1, %c0_2] : memref<16x128xf32, #tpu.memory_space<vmem>>, vector<16x128xf32>
    %cst = arith.constant dense<0.000000e+00> : vector<24x128xf32>
    %2 = tpu.matmul %0, %1, %cst {dimension_numbers = #tpu.dot_dimension_numbers<[1], [0], [0], [1], [0, 0, 1, 1], [], []>} : vector<24x16xf32>, vector<16x128xf32>, vector<24x128xf32> -> vector<24x128xf32>
    %cst_3 = arith.constant 0.000000e+00 : f32
    %3 = vector.broadcast %cst_3 : f32 to vector<24x128xf32>
    %4 = arith.maximumf %2, %3 : vector<24x128xf32>
    %c0_4 = arith.constant 0 : index
    %c0_5 = arith.constant 0 : index
    %c0_6 = arith.constant 0 : index
    %5 = vector.load %arg3[%c0_4, %c0_5, %c0_6] : memref<5x24x24xf32, #tpu.memory_space<vmem>>, vector<1x24x24xf32>
    %6 = vector.shape_cast %5 : vector<1x24x24xf32> to vector<24x24xf32>
    %cst_7 = arith.constant dense<0.000000e+00> : vector<24x128xf32>
    %7 = tpu.matmul %6, %4, %cst_7 {dimension_numbers = #tpu.dot_dimension_numbers<[1], [0], [0], [1], [0, 0, 1, 1], [], []>} : vector<24x24xf32>, vector<24x128xf32>, vector<24x128xf32> -> vector<24x128xf32>
    %cst_8 = arith.constant 0.000000e+00 : f32
    %8 = vector.broadcast %cst_8 : f32 to vector<24x128xf32>
    %9 = arith.maximumf %7, %8 : vector<24x128xf32>
    %c1 = arith.constant 1 : index
    %c0_9 = arith.constant 0 : index
    %c0_10 = arith.constant 0 : index
    %10 = vector.load %arg3[%c1, %c0_9, %c0_10] : memref<5x24x24xf32, #tpu.memory_space<vmem>>, vector<1x24x24xf32>
    %11 = vector.shape_cast %10 : vector<1x24x24xf32> to vector<24x24xf32>
    %cst_11 = arith.constant dense<0.000000e+00> : vector<24x128xf32>
    %12 = tpu.matmul %11, %9, %cst_11 {dimension_numbers = #tpu.dot_dimension_numbers<[1], [0], [0], [1], [0, 0, 1, 1], [], []>} : vector<24x24xf32>, vector<24x128xf32>, vector<24x128xf32> -> vector<24x128xf32>
    %cst_12 = arith.constant 0.000000e+00 : f32
    %13 = vector.broadcast %cst_12 : f32 to vector<24x128xf32>
    %14 = arith.maximumf %12, %13 : vector<24x128xf32>
    %c2 = arith.constant 2 : index
    %c0_13 = arith.constant 0 : index
    %c0_14 = arith.constant 0 : index
    %15 = vector.load %arg3[%c2, %c0_13, %c0_14] : memref<5x24x24xf32, #tpu.memory_space<vmem>>, vector<1x24x24xf32>
    %16 = vector.shape_cast %15 : vector<1x24x24xf32> to vector<24x24xf32>
    %cst_15 = arith.constant dense<0.000000e+00> : vector<24x128xf32>
    %17 = tpu.matmul %16, %14, %cst_15 {dimension_numbers = #tpu.dot_dimension_numbers<[1], [0], [0], [1], [0, 0, 1, 1], [], []>} : vector<24x24xf32>, vector<24x128xf32>, vector<24x128xf32> -> vector<24x128xf32>
    %cst_16 = arith.constant 0.000000e+00 : f32
    %18 = vector.broadcast %cst_16 : f32 to vector<24x128xf32>
    %19 = arith.maximumf %17, %18 : vector<24x128xf32>
    %c3 = arith.constant 3 : index
    %c0_17 = arith.constant 0 : index
    %c0_18 = arith.constant 0 : index
    %20 = vector.load %arg3[%c3, %c0_17, %c0_18] : memref<5x24x24xf32, #tpu.memory_space<vmem>>, vector<1x24x24xf32>
    %21 = vector.shape_cast %20 : vector<1x24x24xf32> to vector<24x24xf32>
    %cst_19 = arith.constant dense<0.000000e+00> : vector<24x128xf32>
    %22 = tpu.matmul %21, %19, %cst_19 {dimension_numbers = #tpu.dot_dimension_numbers<[1], [0], [0], [1], [0, 0, 1, 1], [], []>} : vector<24x24xf32>, vector<24x128xf32>, vector<24x128xf32> -> vector<24x128xf32>
    %cst_20 = arith.constant 0.000000e+00 : f32
    %23 = vector.broadcast %cst_20 : f32 to vector<24x128xf32>
    %24 = arith.maximumf %22, %23 : vector<24x128xf32>
    %c4 = arith.constant 4 : index
    %c0_21 = arith.constant 0 : index
    %c0_22 = arith.constant 0 : index
    %25 = vector.load %arg3[%c4, %c0_21, %c0_22] : memref<5x24x24xf32, #tpu.memory_space<vmem>>, vector<1x24x24xf32>
    %26 = vector.shape_cast %25 : vector<1x24x24xf32> to vector<24x24xf32>
    %cst_23 = arith.constant dense<0.000000e+00> : vector<24x128xf32>
    %27 = tpu.matmul %26, %24, %cst_23 {dimension_numbers = #tpu.dot_dimension_numbers<[1], [0], [0], [1], [0, 0, 1, 1], [], []>} : vector<24x24xf32>, vector<24x128xf32>, vector<24x128xf32> -> vector<24x128xf32>
    %28 = vector.extract_strided_slice %27 {offsets = [0, 0], sizes = [3, 128], strides = [1, 1]} : vector<24x128xf32> to vector<3x128xf32>
    %c0_24 = arith.constant 0 : index
    %c0_25 = arith.constant 0 : index
    %29 = vector.load %arg4[%c0_24, %c0_25] : memref<3x128xf32, #tpu.memory_space<vmem>>, vector<3x128xf32>
    tpu.vector_store %arg4[%c0_24, %c0_25], %28 {strides = array<i32>} : memref<3x128xf32, #tpu.memory_space<vmem>>, vector<3x128xf32>,
    return
  }
  func.func @transform_0(%arg0: i32) -> (i32, i32) {
    %c0_i32 = arith.constant 0 : i32
    %c0_i32_0 = arith.constant 0 : i32
    return %c0_i32, %arg0 : i32, i32
  }
  func.func @transform_1(%arg0: i32) -> (i32, i32) {
    %c0_i32 = arith.constant 0 : i32
    %c0_i32_0 = arith.constant 0 : i32
    %c0_i32_1 = arith.constant 0 : i32
    return %c0_i32, %c0_i32_0 : i32, i32
  }
  func.func @transform_2(%arg0: i32) -> (i32, i32, i32) {
    %c0_i32 = arith.constant 0 : i32
    %c0_i32_0 = arith.constant 0 : i32
    %c0_i32_1 = arith.constant 0 : i32
    %c0_i32_2 = arith.constant 0 : i32
    return %c0_i32, %c0_i32_0, %c0_i32_1 : i32, i32, i32
  }
  func.func @transform_3(%arg0: i32) -> (i32, i32) {
    %c0_i32 = arith.constant 0 : i32
    %c0_i32_0 = arith.constant 0 : i32
    return %c0_i32, %arg0 : i32, i32
  }
}

</mosaic_0001>

<bundles_post_ra>
// kernel: net_forward.1
= control target key start
LH: loop header
LB: loop body
LE: loop exit
PB: predicated region body
PF: predicated region fallthrough
CT: control target
= control target key end

     0   :  { %v747_v0 = vmov 0.0   ;;  %vm748_vm0 = vmmov 0   ;;  %vm19_vm1 = vcmask 130048   ;;  %vm115_vm2 = vcmask 195584   ;;  %s900_s0 = inlined_call_operand.vmem [shape: f32[16,128], index: 0, kind: input, shape index: {}]   ;;  %s901_s1 = inlined_call_operand.vmem [shape: f32[24,16], index: 1, kind: input, shape index: {}]   ;;  %s902_s2 = inlined_call_operand.vmem [shape: f32[5,24,24], index: 2, kind: input, shape index: {}]   ;;  %s903_s3 = inlined_call_operand.vmem [shape: f32[3,128], index: 3, kind: output, shape index: {}]  }
   0x1   :  { %657 = vmatprep.subr.mxu0 %v747_v0  ;;  %v18_v1 = vld [vmem:[%s900_s0 + $0x8] sm:$0xff]  ;;  %v17_v2 = vld [vmem:[%s900_s0] sm:$0xff]  ;;  %661 = vmatprep.mubr.msk.f32.mxu0 %vm748_vm0, %v747_v0  ;;  %v16_v5 = vld [vmem:[%s901_s1 + $0x10] sm:$0xff] }
   0x2   :  { %658 = vmatpush3.msra.mxu0 %v18_v1  ;;  %v14_v3 = vld [vmem:[%s901_s1] sm:$0xff]  ;;  %670 = vmatprep.subr.mxu1 %v747_v0  ;;  %v15_v4 = vld [vmem:[%s901_s1 + $0x8] sm:$0xff]  ;;  %v114_v17 = vld [vmem:[%s902_s2 + $0x10] sm:$0xff] }
   0x3   :  { %659 = vmatprep.subr.mxu0 %v747_v0  ;;  %676 = vmatprep.mubr.msk.f32.mxu1 %vm748_vm0, %v747_v0  ;;  %v112_v15 = vld [vmem:[%s902_s2] sm:$0xff]  ;;  %v113_v16 = vld [vmem:[%s902_s2 + $0x8] sm:$0xff]  ;;  %v598_v27 = vld [vmem:[%s902_s2 + $0x18] sm:$0xff] }
   0x4   :  { %660 = vmatpush3.msra.mxu0 %v17_v2  ;;  %v599_v28 = vld [vmem:[%s902_s2 + $0x20] sm:$0xff]  ;;  %v600_v29 = vld [vmem:[%s902_s2 + $0x28] sm:$0xff]  ;;  %v604_v39 = vld [vmem:[%s902_s2 + $0x30] sm:$0xff] }
   0x5   :  { %662 = vmatmul.mubr.msk.f32.vlgmr.msra.gmra.mxu0 %vm19_vm1, %v14_v3  ;;  %685 = vmatprep.subr.mxu0 %v747_v0  ;;  %v605_v40 = vld [vmem:[%s902_s2 + $0x38] sm:$0xff]  ;;  %v606_v41 = vld [vmem:[%s902_s2 + $0x40] sm:$0xff]  ;;  %v610_v51 = vld [vmem:[%s902_s2 + $0x48] sm:$0xff] }
   0x6   :  { %664 = vmatprep.mubr.msk.f32.mxu0 %vm748_vm0, %v747_v0  ;;  %v611_v52 = vld [vmem:[%s902_s2 + $0x50] sm:$0xff]  ;;  %v612_v53 = vld [vmem:[%s902_s2 + $0x58] sm:$0xff]  ;;  %v616_v63 = vld [vmem:[%s902_s2 + $0x60] sm:$0xff] }
   0x7   :  { %v617_v1 = vld [vmem:[%s902_s2 + $0x68] sm:$0xff]  ;;  %v618_v2 = vld [vmem:[%s902_s2 + $0x70] sm:$0xff] }
   0x9   :  { %665 = vmatmul.mubr.msk.f32.gmra.mxu0 %vm19_vm1, %v15_v4 }
   0xa   :  { %667 = vmatprep.mubr.msk.f32.mxu0 %vm748_vm0, %v747_v0 }
   0xd   :  { %668 = vmatmul.mubr.msk.f32.gmra.mxu0 %vm19_vm1, %v16_v5 }
   0xe   :  { %691 = vmatprep.mubr.msk.f32.mxu0 %vm748_vm0, %v747_v0 }
  0xc5   :  { %v95_v6 = vpop.f32.mrf.mxu0 }
  0xc6   :  { %v109_v14 = vmax.f32 %v95_v6, 0.0 }
  0xc7   :  { %v663_v7 = vpop.f32.mrf.mxu0 }
  0xc9   :  { %v100_v8 = vpop.f32.mrf.mxu0 }
  0xca   :  { %v110_v13 = vmax.f32 %v100_v8, 0.0 }
  0xcb   :  { %v666_v9 = vpop.f32.mrf.mxu0 }
  0xcd   :  { %v105_v10 = vpop.f32.mrf.mxu0 }
  0xce   :  { %v111_v11 = vmax.f32 %v105_v10, 0.0 }
  0xcf   :  { %v669_v12 = vpop.f32.mrf.mxu0 }
  0xd0   :  { %671 = vmatpush3.msra.mxu1 %v111_v11 }
  0xd1   :  { %672 = vmatprep.subr.mxu1 %v747_v0 }
  0xd2   :  { %673 = vmatpush3.msra.mxu1 %v110_v13 }
  0xd3   :  { %674 = vmatprep.subr.mxu1 %v747_v0 }
  0xd4   :  { %675 = vmatpush3.msra.mxu1 %v109_v14 }
  0xd5   :  { %677 = vmatmul.mubr.msk.f32.vlgmr.msra.gmra.mxu1 %vm115_vm2, %v112_v15  ;;  %700 = vmatprep.subr.mxu1 %v747_v0 }
  0xd6   :  { %679 = vmatprep.mubr.msk.f32.mxu1 %vm748_vm0, %v747_v0 }
  0xd9   :  { %680 = vmatmul.mubr.msk.f32.gmra.mxu1 %vm115_vm2, %v113_v16 }
  0xda   :  { %682 = vmatprep.mubr.msk.f32.mxu1 %vm748_vm0, %v747_v0 }
  0xdd   :  { %683 = vmatmul.mubr.msk.f32.gmra.mxu1 %vm115_vm2, %v114_v17 }
  0xde   :  { %706 = vmatprep.mubr.msk.f32.mxu1 %vm748_vm0, %v747_v0 }
 0x195   :  { %v191_v18 = vpop.f32.mrf.mxu1 }
 0x196   :  { %v205_v26 = vmax.f32 %v191_v18, 0.0 }
 0x197   :  { %v678_v19 = vpop.f32.mrf.mxu1 }
 0x199   :  { %v196_v20 = vpop.f32.mrf.mxu1 }
 0x19a   :  { %v206_v25 = vmax.f32 %v196_v20, 0.0 }
 0x19b   :  { %v681_v21 = vpop.f32.mrf.mxu1 }
 0x19d   :  { %v201_v22 = vpop.f32.mrf.mxu1 }
 0x19e   :  { %v207_v23 = vmax.f32 %v201_v22, 0.0 }
 0x19f   :  { %v684_v24 = vpop.f32.mrf.mxu1 }
 0x1a0   :  { %686 = vmatpush3.msra.mxu0 %v207_v23 }
 0x1a1   :  { %687 = vmatprep.subr.mxu0 %v747_v0 }
 0x1a2   :  { %688 = vmatpush3.msra.mxu0 %v206_v25 }
 0x1a3   :  { %689 = vmatprep.subr.mxu0 %v747_v0 }
 0x1a4   :  { %690 = vmatpush3.msra.mxu0 %v205_v26 }
 0x1a5   :  { %692 = vmatmul.mubr.msk.f32.vlgmr.msra.gmra.mxu0 %vm115_vm2, %v598_v27  ;;  %715 = vmatprep.subr.mxu0 %v747_v0 }
 0x1a6   :  { %694 = vmatprep.mubr.msk.f32.mxu0 %vm748_vm0, %v747_v0 }
 0x1a9   :  { %695 = vmatmul.mubr.msk.f32.gmra.mxu0 %vm115_vm2, %v599_v28 }
 0x1aa   :  { %697 = vmatprep.mubr.msk.f32.mxu0 %vm748_vm0, %v747_v0 }
 0x1ad   :  { %698 = vmatmul.mubr.msk.f32.gmra.mxu0 %vm115_vm2, %v600_v29 }
 0x1ae   :  { %721 = vmatprep.mubr.msk.f32.mxu0 %vm748_vm0, %v747_v0 }
 0x265   :  { %v287_v30 = vpop.f32.mrf.mxu0 }
 0x266   :  { %v301_v38 = vmax.f32 %v287_v30, 0.0 }
 0x267   :  { %v693_v31 = vpop.f32.mrf.mxu0 }
 0x269   :  { %v292_v32 = vpop.f32.mrf.mxu0 }
 0x26a   :  { %v302_v37 = vmax.f32 %v292_v32, 0.0 }
 0x26b   :  { %v696_v33 = vpop.f32.mrf.mxu0 }
 0x26d   :  { %v297_v34 = vpop.f32.mrf.mxu0 }
 0x26e   :  { %v303_v35 = vmax.f32 %v297_v34, 0.0 }
 0x26f   :  { %v699_v36 = vpop.f32.mrf.mxu0 }
 0x270   :  { %701 = vmatpush3.msra.mxu1 %v303_v35 }
 0x271   :  { %702 = vmatprep.subr.mxu1 %v747_v0 }
 0x272   :  { %703 = vmatpush3.msra.mxu1 %v302_v37 }
 0x273   :  { %704 = vmatprep.subr.mxu1 %v747_v0 }
 0x274   :  { %705 = vmatpush3.msra.mxu1 %v301_v38 }
 0x275   :  { %707 = vmatmul.mubr.msk.f32.vlgmr.msra.gmra.mxu1 %vm115_vm2, %v604_v39  ;;  %730 = vmatprep.subr.mxu1 %v747_v0 }
 0x276   :  { %709 = vmatprep.mubr.msk.f32.mxu1 %vm748_vm0, %v747_v0 }
 0x279   :  { %710 = vmatmul.mubr.msk.f32.gmra.mxu1 %vm115_vm2, %v605_v40 }
 0x27a   :  { %712 = vmatprep.mubr.msk.f32.mxu1 %vm748_vm0, %v747_v0 }
 0x27d   :  { %713 = vmatmul.mubr.msk.f32.gmra.mxu1 %vm115_vm2, %v606_v41 }
 0x27e   :  { %736 = vmatprep.mubr.msk.f32.mxu1 %vm748_vm0, %v747_v0 }
 0x335   :  { %v383_v42 = vpop.f32.mrf.mxu1 }
 0x336   :  { %v397_v50 = vmax.f32 %v383_v42, 0.0 }
 0x337   :  { %v708_v43 = vpop.f32.mrf.mxu1 }
 0x339   :  { %v388_v44 = vpop.f32.mrf.mxu1 }
 0x33a   :  { %v398_v49 = vmax.f32 %v388_v44, 0.0 }
 0x33b   :  { %v711_v45 = vpop.f32.mrf.mxu1 }
 0x33d   :  { %v393_v46 = vpop.f32.mrf.mxu1 }
 0x33e   :  { %v399_v47 = vmax.f32 %v393_v46, 0.0 }
 0x33f   :  { %v714_v48 = vpop.f32.mrf.mxu1 }
 0x340   :  { %716 = vmatpush3.msra.mxu0 %v399_v47 }
 0x341   :  { %717 = vmatprep.subr.mxu0 %v747_v0 }
 0x342   :  { %718 = vmatpush3.msra.mxu0 %v398_v49 }
 0x343   :  { %719 = vmatprep.subr.mxu0 %v747_v0 }
 0x344   :  { %720 = vmatpush3.msra.mxu0 %v397_v50 }
 0x345   :  { %722 = vmatmul.mubr.msk.f32.vlgmr.msra.gmra.mxu0 %vm115_vm2, %v610_v51 }
 0x346   :  { %724 = vmatprep.mubr.msk.f32.mxu0 %vm748_vm0, %v747_v0 }
 0x349   :  { %725 = vmatmul.mubr.msk.f32.gmra.mxu0 %vm115_vm2, %v611_v52 }
 0x34a   :  { %727 = vmatprep.mubr.msk.f32.mxu0 %vm748_vm0, %v747_v0 }
 0x34d   :  { %728 = vmatmul.mubr.msk.f32.gmra.mxu0 %vm115_vm2, %v612_v53 }
 0x405   :  { %v479_v54 = vpop.f32.mrf.mxu0 }
 0x406   :  { %v493_v62 = vmax.f32 %v479_v54, 0.0 }
 0x407   :  { %v723_v55 = vpop.f32.mrf.mxu0 }
 0x409   :  { %v484_v56 = vpop.f32.mrf.mxu0 }
 0x40a   :  { %v494_v61 = vmax.f32 %v484_v56, 0.0 }
 0x40b   :  { %v726_v57 = vpop.f32.mrf.mxu0 }
 0x40d   :  { %v489_v58 = vpop.f32.mrf.mxu0 }
 0x40e   :  { %v495_v59 = vmax.f32 %v489_v58, 0.0 }
 0x40f   :  { %v729_v60 = vpop.f32.mrf.mxu0 }
 0x410   :  { %731 = vmatpush3.msra.mxu1 %v495_v59 }
 0x411   :  { %732 = vmatprep.subr.mxu1 %v747_v0 }
 0x412   :  { %733 = vmatpush3.msra.mxu1 %v494_v61 }
 0x413   :  { %734 = vmatprep.subr.mxu1 %v747_v0 }
 0x414   :  { %735 = vmatpush3.msra.mxu1 %v493_v62 }
 0x415   :  { %737 = vmatmul.mubr.msk.f32.vlgmr.msra.gmra.mxu1 %vm115_vm2, %v616_v63 }
 0x416   :  { %739 = vmatprep.mubr.msk.f32.mxu1 %vm748_vm0, %v747_v0 }
 0x419   :  { %740 = vmatmul.mubr.msk.f32.gmra.mxu1 %vm115_vm2, %v617_v1 }
 0x41a   :  { %742 = vmatprep.mubr.msk.f32.mxu1 %vm748_vm0, %v747_v0 }
 0x41d   :  { %743 = vmatmul.mubr.msk.f32.gmra.mxu1 %vm115_vm2, %v618_v2 }
 0x4d5   :  { %v575_v3 = vpop.f32.mrf.mxu1 }
 0x4d6   :  { %587 = vst [vmem:[%s903_s3] sm:$0x7] %v575_v3 }
 0x4d7   :  { %v738_v4 = vpop.f32.mrf.mxu1 }
 0x4d9   :  { %v580_v5 = vpop.f32.mrf.mxu1 }
 0x4db   :  { %v741_v6 = vpop.f32.mrf.mxu1 }
 0x4dd   :  { %v584_v7 = vpop.f32.mrf.mxu1 }
 0x4df   :  { %v744_v8 = vpop.f32.mrf.mxu1 }

</bundles_post_ra>
